<compile_context>
chip_gen: v5e
topology: v5e:2x2
jax: 0.10.0
libtpu: 0.0.40
codegen_flags: <defaults>
</compile_context>

<pallas_src>
import math

import jax
import jax.numpy as jnp
import numpy as np
from jax import lax
from jax.experimental import pallas as pl
from jax.experimental.pallas import tpu as pltpu


def l1outub_kernel(x_ref, y_ref, w1_ref, b1_ref, w2m_ref, b2m_ref,
                   w2v_ref, b2v_ref, out_ref):
    x = x_ref[...]                      # [N, Dx]
    y = y_ref[...]                      # [N, Dy]
    n = y.shape[0]                      # static Python int
    n_f = float(n)

    # ---- MLP heads: fused first layer, zero-padded second-layer weights ----
    h = jnp.maximum(
        jnp.dot(x, w1_ref[...], preferred_element_type=jnp.float32) + b1_ref[...],
        0.0)                                                        # [N, 2*h2]
    mu = jnp.dot(h, w2m_ref[...], preferred_element_type=jnp.float32) + b2m_ref[...]
    logvar = jnp.tanh(
        jnp.dot(h, w2v_ref[...], preferred_element_type=jnp.float32) + b2v_ref[...])

    inv_var = jnp.exp(-logvar)          # single EUP exp per element, reused

    # ---- positive term: mean_j sum_d( -(mu-y)^2/2*inv_var - logvar/2 ) -----
    diff = mu - y
    pos_sum = jnp.sum(-0.5 * diff * diff * inv_var - 0.5 * logvar)

    # ---- negative term, fully collapsed to O(N*Dy) --------------------------
    # all_probs[i,j] = -0.5*( sum_d inv[i,d]*y[j,d]^2 - 2*sum_d (mu*inv)[i,d]*y[j,d]
    #                         + sum_d mu[i,d]^2*inv[i,d] ) - 0.5*sum_d logvar[i,d]
    # It is only consumed via sum_{i,j}, which factorizes into column sums.
    mui = mu * inv_var
    s_inv = jnp.sum(inv_var, axis=0, keepdims=True)    # [1, Dy]
    s_mui = jnp.sum(mui, axis=0, keepdims=True)        # [1, Dy]
    s_y = jnp.sum(y, axis=0, keepdims=True)            # [1, Dy]
    s_yy = jnp.sum(y * y, axis=0, keepdims=True)       # [1, Dy]
    quad_sum = jnp.sum(mu * mui)                       # sum_i sum_d mu^2*inv
    slv_sum = jnp.sum(logvar)

    cross = jnp.sum(s_inv * s_yy - 2.0 * s_mui * s_y)
    pair_sum = -0.5 * (cross + n_f * quad_sum) - 0.5 * n_f * slv_sum

    # Exact collapse of the torch broadcast + stable LSE:
    #   negative[i,j] = all_probs[i,j] + log((N-1)+exp(-20)) - log(N-1)
    lse_const = math.log((n - 1.0) + math.exp(-20.0)) - math.log(n - 1.0)
    neg_mean = pair_sum / (n_f * n_f) + lse_const

    # (positive - negative).mean() == mean(positive) - mean(negative)
    out_ref[0, 0] = pos_sum / n_f - neg_mean


def l1outub_forward(x, y, params):
    assert y.shape[0] >= 2, "L1OutUB needs batch_size >= 2 (log(N-1))"
    h2 = params["w1_mu"].shape[1]
    dy = params["w2_mu"].shape[1]

    # Fuse the first-layer heads (exact); zero-pad second-layer weights so the
    # kernel never slices along the lane dimension.
    w1 = jnp.concatenate([params["w1_mu"], params["w1_lv"]], axis=1)   # [Dx, 2*h2]
    b1 = jnp.concatenate([params["b1_mu"], params["b1_lv"]], axis=1)   # [1, 2*h2]
    zeros = jnp.zeros((h2, dy), jnp.float32)
    w2m = jnp.concatenate([params["w2_mu"], zeros], axis=0)            # [2*h2, Dy]
    w2v = jnp.concatenate([zeros, params["w2_lv"]], axis=0)            # [2*h2, Dy]

    args = (x, y, w1, b1, w2m, params["b2_mu"], w2v, params["b2_lv"])
    out = pl.pallas_call(
        l1outub_kernel,
        out_shape=jax.ShapeDtypeStruct((1, 1), jnp.float32),
        in_specs=[pl.BlockSpec(memory_space=pltpu.MemorySpace.VMEM) for _ in args],
        out_specs=pl.BlockSpec(memory_space=pltpu.MemorySpace.SMEM),
    )(*args)
    return out[0, 0]


def init_params(key, x_dim, y_dim, hidden_size):
    """Deterministic torch.nn.Linear-style init (uniform +/- 1/sqrt(fan_in))."""
    h2 = hidden_size // 2
    ks = jax.random.split(key, 8)

    def linear(kw, kb, fan_in, fan_out):
        bound = 1.0 / math.sqrt(fan_in)
        w = jax.random.uniform(kw, (fan_in, fan_out), jnp.float32, -bound, bound)
        b = jax.random.uniform(kb, (1, fan_out), jnp.float32, -bound, bound)
        return w, b

    w1m, b1m = linear(ks[0], ks[1], x_dim, h2)
    w2m, b2m = linear(ks[2], ks[3], h2, y_dim)
    w1v, b1v = linear(ks[4], ks[5], x_dim, h2)
    w2v, b2v = linear(ks[6], ks[7], h2, y_dim)
    return dict(w1_mu=w1m, b1_mu=b1m, w2_mu=w2m, b2_mu=b2m,
                w1_lv=w1v, b1_lv=b1v, w2_lv=w2v, b2_lv=b2v)


def l1outub_reference(x, y, p):
    """Pure-JAX faithful replica of the PyTorch forward (including the
    [N,N,N] broadcast of diag_mask), used only for validation."""
    hp = lax.Precision.HIGHEST
    n = y.shape[0]
    h_mu = jnp.maximum(jnp.dot(x, p["w1_mu"], precision=hp) + p["b1_mu"], 0.0)
    mu = jnp.dot(h_mu, p["w2_mu"], precision=hp) + p["b2_mu"]
    h_lv = jnp.maximum(jnp.dot(x, p["w1_lv"], precision=hp) + p["b1_lv"], 0.0)
    logvar = jnp.tanh(jnp.dot(h_lv, p["w2_lv"], precision=hp) + p["b2_lv"])

    positive = jnp.sum(-(mu - y) ** 2 / 2.0 / jnp.exp(logvar) - logvar / 2.0, axis=-1)
    all_probs = jnp.sum(
        -(y[None, :, :] - mu[:, None, :]) ** 2 / 2.0 / jnp.exp(logvar[:, None, :])
        - logvar[:, None, :] / 2.0, axis=-1)
    diag_mask = jnp.eye(n, dtype=jnp.float32)[:, :, None] * (-20.0)
    val = all_probs + diag_mask                      # [N,N,N] (torch broadcasting)
    m = jnp.max(val, axis=0, keepdims=True)
    lse = jnp.squeeze(m, 0) + jnp.log(jnp.sum(jnp.exp(val - m), axis=0))
    negative = lse - jnp.log(n - 1.0)
    return jnp.mean(positive - negative)


if __name__ == "__main__":
    N, X_DIM, Y_DIM, HIDDEN = 8, 16, 16, 32

    root = jax.random.PRNGKey(0)
    k_params, k_x, k_y = jax.random.split(root, 3)

    params = init_params(k_params, X_DIM, Y_DIM, HIDDEN)
    x = jax.random.normal(k_x, (N, X_DIM), jnp.float32)
    y = jax.random.normal(k_y, (N, Y_DIM), jnp.float32)

    out = l1outub_forward(x, y, params)
    out = jax.block_until_ready(out)

    ref = jax.block_until_ready(l1outub_reference(x, y, params))
    # Tolerance covers default-precision MXU matmuls in-kernel vs. the
    # HIGHEST-precision elementwise reference and the changed summation order.
    if not np.allclose(np.asarray(out), np.asarray(ref), rtol=5e-2, atol=1e-1):
        raise AssertionError(f"mismatch: kernel={float(out)} ref={float(ref)}")

    print("KERNEL_OK")
</pallas_src>

<mosaic_0001>
module attributes {stable_mosaic.version = 11 : i64} {
  func.func @l1outub_kernel(%arg0: memref<8x16xf32, #tpu.memory_space<vmem>>, %arg1: memref<8x16xf32, #tpu.memory_space<vmem>>, %arg2: memref<16x32xf32, #tpu.memory_space<vmem>>, %arg3: memref<1x32xf32, #tpu.memory_space<vmem>>, %arg4: memref<32x16xf32, #tpu.memory_space<vmem>>, %arg5: memref<1x16xf32, #tpu.memory_space<vmem>>, %arg6: memref<32x16xf32, #tpu.memory_space<vmem>>, %arg7: memref<1x16xf32, #tpu.memory_space<vmem>>, %arg8: memref<1x1xf32, #tpu.memory_space<smem>>) attributes {dimension_semantics = [], scalar_prefetch = 0 : i64, scratch_operands = 0 : i64, tpu.core_type = #tpu.core_type<tc>} {
    %c0 = arith.constant 0 : index
    %c0_0 = arith.constant 0 : index
    %0 = vector.load %arg0[%c0, %c0_0] : memref<8x16xf32, #tpu.memory_space<vmem>>, vector<8x16xf32>
    %c0_1 = arith.constant 0 : index
    %c0_2 = arith.constant 0 : index
    %1 = vector.load %arg1[%c0_1, %c0_2] : memref<8x16xf32, #tpu.memory_space<vmem>>, vector<8x16xf32>
    %c0_3 = arith.constant 0 : index
    %c0_4 = arith.constant 0 : index
    %2 = vector.load %arg2[%c0_3, %c0_4] : memref<16x32xf32, #tpu.memory_space<vmem>>, vector<16x32xf32>
    %cst = arith.constant dense<0.000000e+00> : vector<8x32xf32>
    %3 = tpu.matmul %0, %2, %cst {dimension_numbers = #tpu.dot_dimension_numbers<[1], [0], [0], [1], [0, 0, 1, 1], [], []>} : vector<8x16xf32>, vector<16x32xf32>, vector<8x32xf32> -> vector<8x32xf32>
    %c0_5 = arith.constant 0 : index
    %c0_6 = arith.constant 0 : index
    %4 = vector.load %arg3[%c0_5, %c0_6] : memref<1x32xf32, #tpu.memory_space<vmem>>, vector<1x32xf32>
    %5 = vector.broadcast %4 : vector<1x32xf32> to vector<8x32xf32>
    %6 = arith.addf %3, %5 : vector<8x32xf32>
    %cst_7 = arith.constant 0.000000e+00 : f32
    %7 = vector.broadcast %cst_7 : f32 to vector<8x32xf32>
    %8 = arith.maximumf %6, %7 : vector<8x32xf32>
    %c0_8 = arith.constant 0 : index
    %c0_9 = arith.constant 0 : index
    %9 = vector.load %arg4[%c0_8, %c0_9] : memref<32x16xf32, #tpu.memory_space<vmem>>, vector<32x16xf32>
    %cst_10 = arith.constant dense<0.000000e+00> : vector<8x16xf32>
    %10 = tpu.matmul %8, %9, %cst_10 {dimension_numbers = #tpu.dot_dimension_numbers<[1], [0], [0], [1], [0, 0, 1, 1], [], []>} : vector<8x32xf32>, vector<32x16xf32>, vector<8x16xf32> -> vector<8x16xf32>
    %c0_11 = arith.constant 0 : index
    %c0_12 = arith.constant 0 : index
    %11 = vector.load %arg5[%c0_11, %c0_12] : memref<1x16xf32, #tpu.memory_space<vmem>>, vector<1x16xf32>
    %12 = vector.broadcast %11 : vector<1x16xf32> to vector<8x16xf32>
    %13 = arith.addf %10, %12 : vector<8x16xf32>
    %c0_13 = arith.constant 0 : index
    %c0_14 = arith.constant 0 : index
    %14 = vector.load %arg6[%c0_13, %c0_14] : memref<32x16xf32, #tpu.memory_space<vmem>>, vector<32x16xf32>
    %cst_15 = arith.constant dense<0.000000e+00> : vector<8x16xf32>
    %15 = tpu.matmul %8, %14, %cst_15 {dimension_numbers = #tpu.dot_dimension_numbers<[1], [0], [0], [1], [0, 0, 1, 1], [], []>} : vector<8x32xf32>, vector<32x16xf32>, vector<8x16xf32> -> vector<8x16xf32>
    %c0_16 = arith.constant 0 : index
    %c0_17 = arith.constant 0 : index
    %16 = vector.load %arg7[%c0_16, %c0_17] : memref<1x16xf32, #tpu.memory_space<vmem>>, vector<1x16xf32>
    %17 = vector.broadcast %16 : vector<1x16xf32> to vector<8x16xf32>
    %18 = arith.addf %15, %17 : vector<8x16xf32>
    %19 = math.tanh %18 : vector<8x16xf32>
    %cst_18 = arith.constant 0.000000e+00 : f32
    %20 = vector.broadcast %cst_18 : f32 to vector<8x16xf32>
    %21 = arith.subf %20, %19 : vector<8x16xf32>
    %22 = math.exp %21 : vector<8x16xf32>
    %23 = arith.subf %13, %1 : vector<8x16xf32>
    %cst_19 = arith.constant -5.000000e-01 : f32
    %24 = vector.broadcast %cst_19 : f32 to vector<8x16xf32>
    %25 = arith.mulf %24, %23 : vector<8x16xf32>
    %26 = arith.mulf %25, %23 : vector<8x16xf32>
    %27 = arith.mulf %26, %22 : vector<8x16xf32>
    %cst_20 = arith.constant 5.000000e-01 : f32
    %28 = vector.broadcast %cst_20 : f32 to vector<8x16xf32>
    %29 = arith.mulf %28, %19 : vector<8x16xf32>
    %30 = arith.subf %27, %29 : vector<8x16xf32>
    %31 = vector.shape_cast %30 : vector<8x16xf32> to vector<1x8x16xf32>
    %cst_21 = arith.constant dense<0.000000e+00> : vector<1xf32>
    %32 = vector.multi_reduction <add>, %31, %cst_21 [1, 2] : vector<1x8x16xf32> to vector<1xf32>
    %33 = vector.shape_cast %32 : vector<1xf32> to vector<1x1x1xf32>
    %34 = vector.extract %33[0, 0, 0] : f32 from vector<1x1x1xf32>
    %35 = arith.mulf %13, %22 : vector<8x16xf32>
    %cst_22 = arith.constant dense<0.000000e+00> : vector<16xf32>
    %36 = vector.multi_reduction <add>, %22, %cst_22 [0] : vector<8x16xf32> to vector<16xf32>
    %37 = vector.shape_cast %36 : vector<16xf32> to vector<1x16xf32>
    %cst_23 = arith.constant dense<0.000000e+00> : vector<16xf32>
    %38 = vector.multi_reduction <add>, %35, %cst_23 [0] : vector<8x16xf32> to vector<16xf32>
    %39 = vector.shape_cast %38 : vector<16xf32> to vector<1x16xf32>
    %cst_24 = arith.constant dense<0.000000e+00> : vector<16xf32>
    %40 = vector.multi_reduction <add>, %1, %cst_24 [0] : vector<8x16xf32> to vector<16xf32>
    %41 = vector.shape_cast %40 : vector<16xf32> to vector<1x16xf32>
    %42 = arith.mulf %1, %1 : vector<8x16xf32>
    %cst_25 = arith.constant dense<0.000000e+00> : vector<16xf32>
    %43 = vector.multi_reduction <add>, %42, %cst_25 [0] : vector<8x16xf32> to vector<16xf32>
    %44 = vector.shape_cast %43 : vector<16xf32> to vector<1x16xf32>
    %45 = arith.mulf %13, %35 : vector<8x16xf32>
    %46 = vector.shape_cast %45 : vector<8x16xf32> to vector<1x8x16xf32>
    %cst_26 = arith.constant dense<0.000000e+00> : vector<1xf32>
    %47 = vector.multi_reduction <add>, %46, %cst_26 [1, 2] : vector<1x8x16xf32> to vector<1xf32>
    %48 = vector.shape_cast %47 : vector<1xf32> to vector<1x1x1xf32>
    %49 = vector.extract %48[0, 0, 0] : f32 from vector<1x1x1xf32>
    %50 = vector.shape_cast %19 : vector<8x16xf32> to vector<1x8x16xf32>
    %cst_27 = arith.constant dense<0.000000e+00> : vector<1xf32>
    %51 = vector.multi_reduction <add>, %50, %cst_27 [1, 2] : vector<1x8x16xf32> to vector<1xf32>
    %52 = vector.shape_cast %51 : vector<1xf32> to vector<1x1x1xf32>
    %53 = vector.extract %52[0, 0, 0] : f32 from vector<1x1x1xf32>
    %54 = arith.mulf %37, %44 : vector<1x16xf32>
    %cst_28 = arith.constant 2.000000e+00 : f32
    %55 = vector.broadcast %cst_28 : f32 to vector<1x16xf32>
    %56 = arith.mulf %55, %39 : vector<1x16xf32>
    %57 = arith.mulf %56, %41 : vector<1x16xf32>
    %58 = arith.subf %54, %57 : vector<1x16xf32>
    %59 = vector.shape_cast %58 : vector<1x16xf32> to vector<1x1x16xf32>
    %cst_29 = arith.constant dense<0.000000e+00> : vector<1xf32>
    %60 = vector.multi_reduction <add>, %59, %cst_29 [1, 2] : vector<1x1x16xf32> to vector<1xf32>
    %61 = vector.shape_cast %60 : vector<1xf32> to vector<1x1x1xf32>
    %62 = vector.extract %61[0, 0, 0] : f32 from vector<1x1x1xf32>
    %cst_30 = arith.constant 8.000000e+00 : f32
    %63 = arith.mulf %cst_30, %49 : f32
    %64 = arith.addf %62, %63 : f32
    %cst_31 = arith.constant -5.000000e-01 : f32
    %65 = arith.mulf %cst_31, %64 : f32
    %cst_32 = arith.constant 4.000000e+00 : f32
    %66 = arith.mulf %cst_32, %53 : f32
    %67 = arith.subf %65, %66 : f32
    %cst_33 = arith.constant 6.400000e+01 : f32
    %68 = arith.divf %67, %cst_33 : f32
    %cst_34 = arith.constant 2.94450686E-10 : f32
    %69 = arith.addf %68, %cst_34 : f32
    %cst_35 = arith.constant 8.000000e+00 : f32
    %70 = arith.divf %34, %cst_35 : f32
    %71 = arith.subf %70, %69 : f32
    %c0_36 = arith.constant 0 : index
    %c0_37 = arith.constant 0 : index
    %72 = memref.load %arg8[%c0_36, %c0_37] : memref<1x1xf32, #tpu.memory_space<smem>>
    memref.store %71, %arg8[%c0_36, %c0_37] : memref<1x1xf32, #tpu.memory_space<smem>>
    return
  }
}

</mosaic_0001>

<bundles_post_ra>
// kernel: tpu_custom_call.1
= control target key start
LH: loop header
LB: loop body
LE: loop exit
PB: predicated region body
PF: predicated region fallthrough
CT: control target
= control target key end

     0   :  { %vm38_vm0 = vcmask 130048   ;;  %s398_s0 = inlined_call_operand.vmem [shape: f32[8,16], index: 0, kind: input, shape index: {}]   ;;  %s399_s1 = inlined_call_operand.vmem [shape: f32[8,16], index: 1, kind: input, shape index: {}]   ;;  %s400_s2 = inlined_call_operand.vmem [shape: f32[16,32], index: 2, kind: input, shape index: {}]   ;;  %s401_s3 = inlined_call_operand.vmem [shape: f32[1,32], index: 3, kind: input, shape index: {}]   ;;  %s402_s4 = inlined_call_operand.vmem [shape: f32[32,16], index: 4, kind: input, shape index: {}]   ;;  %s403_s5 = inlined_call_operand.vmem [shape: f32[1,16], index: 5, kind: input, shape index: {}]   ;;  %s404_s6 = inlined_call_operand.vmem [shape: f32[32,16], index: 6, kind: input, shape index: {}]   ;;  %s405_s7 = inlined_call_operand.vmem [shape: f32[1,16], index: 7, kind: input, shape index: {}]   ;;  %s406_s8 = inlined_call_operand.hbm [shape: f32[1,1], index: 8, kind: output, shape index: {}]  }
   0x1   :  { %v33_v0 = vld [vmem:[%s400_s2 + $0x8] sm:$0xff]  ;;  %v32_v1 = vld [vmem:[%s400_s2] sm:$0xff]  ;;  %v66_v3 = vld [vmem:[%s402_s4 + $0x18] sm:$0xff] }
   0x2   :  { %v30_v2 = vld [vmem:[%s398_s0] sm:$0xff]  ;;  %56 = vmatpush.msra.mxu0 %v33_v0  ;;  %v98_v4 = vld [vmem:[%s404_s6 + $0x18] sm:$0xff]  ;;  %87 = vmatpush.msra.mxu1 %v66_v3 }
   0x3   :  { %115 = vmatpush.msra.mxu2 %v98_v4 }
   0x4   :  { %57 = vmatpush.msra.mxu0 %v32_v1 }
   0x5   :  { %13 = vsyncpa [#allocation3], 0  ;;  %251 = vmatmul.msk.f32.vlgmr.msra.gmra.mxu0 %vm38_vm0, %v30_v2  ;;  %v65_v5 = vld [vmem:[%s402_s4 + $0x10] sm:$0xff]  ;;  %v64_v7 = vld [vmem:[%s402_s4 + $0x8] sm:$0xff]  ;;  %vm71_vm1 = vcmask 261120   ;;  %vm198_vm2 = vcmask 122880  }
   0x6   :  { %v97_v6 = vld [vmem:[%s404_s6 + $0x10] sm:$0xff]  ;;  %88 = vmatpush.msra.mxu1 %v65_v5  ;;  %v96_v8 = vld [vmem:[%s404_s6 + $0x8] sm:$0xff]  ;;  %v63_v9 = vld [vmem:[%s402_s4] sm:$0xff]  ;;  %s241_s17 = sshll.u32 %s406_s8, 4  ;;  %s296_s21 = smov [#allocation2]   ;;  %s242_s17 = int_to_ptr.hbm [resolvable:$true] %s241_s17 }
   0x7   :  { %116 = vmatpush.msra.mxu2 %v97_v6  ;;  %v95_v10 = vld [vmem:[%s404_s6] sm:$0xff] }
   0x8   :  { %89 = vmatpush.msra.mxu1 %v64_v7  ;;  %v269_v11 = vld [vmem:[%s401_s3] ss:$0 sm:$0xff] }
   0x9   :  { %117 = vmatpush.msra.mxu2 %v96_v8  ;;  %v271_v15 = vld [vmem:[%s405_s7] ss:$0 sm:$0xff] }
   0xa   :  { %90 = vmatpush.msra.mxu1 %v63_v9  ;;  %v270_v18 = vld [vmem:[%s403_s5] ss:$0 sm:$0xff] }
   0xb   :  { %118 = vmatpush.msra.mxu2 %v95_v10  ;;  %v31_v20 = vld [vmem:[%s399_s1] sm:$0xff] }
   0xc   :  { %v165_v22 = vmul.f32 %v31_v20, %v31_v20  ;;  %v158_v27 = vsel %vm38_vm0, %v31_v20, 0.0 }
   0xd   :  { %v159_v30 = vrot.slane %v158_v27, 4 }
   0xe   :  { %v166_v28 = vsel %vm38_vm0, %v165_v22, 0.0 }
   0xf   :  { %v167_v31 = vrot.slane %v166_v28, 4  ;;  %v160_v33 = vadd.f32 %v159_v30, %v158_v27 }
  0x11   :  { %v168_v34 = vadd.f32 %v167_v31, %v166_v28  ;;  %v161_v42 = vrot.slane %v160_v33, 2 }
  0x13   :  { %v169_v43 = vrot.slane %v168_v34, 2  ;;  %v162_v51 = vadd.f32 %v161_v42, %v160_v33 }
  0x15   :  { %v170_v52 = vadd.f32 %v169_v43, %v168_v34  ;;  %v163_v58 = vrot.slane %v162_v51, 1 }
  0x17   :  { %v171_v59 = vrot.slane %v170_v52, 1  ;;  %v164_v0 = vadd.f32 %v163_v58, %v162_v51 }
  0x19   :  { %v172_v1 = vadd.f32 %v171_v59, %v170_v52 }
  0x82   :  { %v59_v12 = vpop.f32.mrf.mxu0 }
  0x83   :  { %v60_v13 = vadd.f32 %v269_v11, %v59_v12  ;;  %v294_v12 = vmov 64.0  }
  0x85   :  { %v62_v14 = vmax.f32 %v60_v13, 0.0 }
  0x87   :  { %252 = vmatmul.msk.f32.vlgmr.msra.gmra.mxu1 %vm71_vm1, %v62_v14  ;;  %253 = vmatmul.msk.f32.vlgmr.msra.gmra.mxu2 %vm71_vm1, %v62_v14  ;;  %v295_v14 = vmov 8.0  }
 0x104   :  { %v92_v19 = vpop.f32.mrf.mxu1 }
 0x105   :  { %v93_v21 = vadd.f32 %v270_v18, %v92_v19 }
 0x107   :  { %v127_v26 = vsub.f32 %v93_v21, %v31_v20 }
 0x109   :  { %v128_v32 = vmul.f32 -0.5, %v127_v26 }
 0x10a   :  { %v120_v16 = vpop.f32.mrf.mxu2 }
 0x10b   :  { %v121_v17 = vadd.f32 %v271_v15, %v120_v16  ;;  %v129_v35 = vmul.f32 %v128_v32, %v127_v26 }
 0x10d   :  { %272 = vtanh.f32 %v121_v17 }
 0x113   :  { %v273_v23 = vpop.eup %272 }
 0x114   :  { %v124_v24 = vsub.f32 0.0, %v273_v23  ;;  %v184_v25 = vsel %vm38_vm0, %v273_v23, 0.0  ;;  %v131_v38 = vmul.f32 0.5, %v273_v23 }
 0x115   :  { %185 = vadd.xlane.f32.xlu1 %v184_v25 }
 0x116   :  { %v125_v29 = vmul.f32 1.442695, %v124_v24 }
 0x118   :  { %274 = vpow2.f32 %v125_v29 }
 0x119   :  { %276 = vrcp.f32 %v294_v12 }
 0x11a   :  { %278 = vrcp.f32 %v295_v14 }
 0x11e   :  { %v275_v36 = vpop.eup %274 }
 0x11f   :  { %v130_v37 = vmul.f32 %v275_v36, %v129_v35  ;;  %v143_v39 = vmul.f32 %v275_v36, %v93_v21  ;;  %v144_v40 = vsel %vm38_vm0, %v275_v36, 0.0  ;;  %v277_v19 = vpop.eup %276 }
 0x120   :  { %v145_v41 = vrot.slane %v144_v40, 4  ;;  %v279_v22 = vpop.eup %278  ;;  %v215_v26 = vmul.f32 64.0, %v277_v19  ;;  %vm219_vm3 = vweird.f32 %v277_v19 }
 0x121   :  { %v132_v44 = vsub.f32 %v130_v37, %v131_v38  ;;  %v151_v45 = vsel %vm38_vm0, %v143_v39, 0.0  ;;  %v173_v55 = vmul.f32 %v143_v39, %v93_v21  ;;  %v225_v28 = vmul.f32 8.0, %v279_v22 }
 0x122   :  { %v152_v46 = vrot.slane %v151_v45, 4  ;;  %v146_v47 = vadd.f32 %v145_v41, %v144_v40  ;;  %v216_v31 = vsub.f32 1.0, %v215_v26  ;;  %vm229_vm4 = vweird.f32 %v279_v22 }
 0x123   :  { %v133_v48 = vsel %vm38_vm0, %v132_v44, 0.0  ;;  %v174_v61 = vsel %vm38_vm0, %v173_v55, 0.0  ;;  %v226_v34 = vsub.f32 1.0, %v225_v28 }
 0x124   :  { %134 = vadd.xlane.f32.xlu0 %v133_v48  ;;  %v153_v49 = vadd.f32 %v152_v46, %v151_v45  ;;  %v147_v50 = vrot.slane %v146_v47, 2  ;;  %v217_v39 = vmul.f32 %v277_v19, %v216_v31 }
 0x125   :  { %v227_v40 = vmul.f32 %v279_v22, %v226_v34 }
 0x126   :  { %v154_v53 = vrot.slane %v153_v49, 2  ;;  %v148_v54 = vadd.f32 %v147_v50, %v146_v47  ;;  %v218_v43 = vadd.f32 %v277_v19, %v217_v39 }
 0x127   :  { %v228_v44 = vadd.f32 %v279_v22, %v227_v40 }
 0x128   :  { %v149_v56 = vrot.slane %v148_v54, 1  ;;  %v155_v57 = vadd.f32 %v154_v53, %v153_v49  ;;  %v220_v47 = vsel %vm219_vm3, %v277_v19, %v218_v43 }
 0x129   :  { %v230_v48 = vsel %vm229_vm4, %v279_v22, %v228_v44 }
 0x12a   :  { %v156_v60 = vrot.slane %v155_v57, 1  ;;  %v150_v62 = vadd.f32 %v149_v56, %v148_v54 }
 0x12c   :  { %175 = vadd.xlane.f32.xlu0 %v174_v61  ;;  %v157_v63 = vadd.f32 %v156_v60, %v155_v57  ;;  %v194_v3 = vmul.f32 %v172_v1, %v150_v62 }
 0x12e   :  { %v195_v2 = vmul.f32 2.0, %v157_v63 }
 0x130   :  { %v196_v4 = vmul.f32 %v195_v2, %v164_v0 }
 0x132   :  { %v197_v5 = vsub.f32 %v194_v3, %v196_v4 }
 0x134   :  { %v199_v6 = vsel %vm198_vm2, %v197_v5, 0.0 }
 0x135   :  { %200 = vadd.xlane.f32.xlu1 %v199_v6 }
 0x188   :  { %v186_v7 = vpop.xlane.xlu1 %185 }
 0x189   :  { %v187_v8 = vrot.slane %v186_v7, 4 }
 0x18b   :  { %v188_v13 = vadd.f32 %v187_v8, %v186_v7 }
 0x18d   :  { %v189_v17 = vrot.slane %v188_v13, 2 }
 0x18f   :  { %v190_v25 = vadd.f32 %v189_v17, %v188_v13 }
 0x191   :  { %v191_v30 = vrot.slane %v190_v25, 1 }
 0x193   :  { %v192_v38 = vadd.f32 %v191_v30, %v190_v25 }
 0x197   :  { %v135_v9 = vpop.xlane.xlu0 %134 }
 0x198   :  { %v136_v10 = vrot.slane %v135_v9, 4 }
 0x19a   :  { %v137_v11 = vadd.f32 %v136_v10, %v135_v9 }
 0x19c   :  { %v138_v15 = vrot.slane %v137_v11, 2 }
 0x19e   :  { %v139_v16 = vadd.f32 %v138_v15, %v137_v11 }
 0x19f   :  { %v176_v18 = vpop.xlane.xlu0 %175 }
 0x1a0   :  { %v177_v20 = vrot.slane %v176_v18, 4  ;;  %v140_v21 = vrot.slane %v139_v16, 1 }
 0x1a2   :  { %v178_v23 = vadd.f32 %v177_v20, %v176_v18  ;;  %v141_v24 = vadd.f32 %v140_v21, %v139_v16 }
 0x1a4   :  { %v179_v27 = vrot.slane %v178_v23, 2  ;;  %254 = vpush %v141_v24 }
 0x1a6   :  { %v180_v29 = vadd.f32 %v179_v27, %v178_v23 }
 0x1a8   :  { %v201_v32 = vpop.xlane.xlu1 %200  ;;  %v181_v33 = vrot.slane %v180_v29, 1 }
 0x1a9   :  { %v202_v35 = vrot.slane %v201_v32, 4 }
 0x1aa   :  { %v182_v36 = vadd.f32 %v181_v33, %v180_v29 }
 0x1ab   :  { %v203_v37 = vadd.f32 %v202_v35, %v201_v32 }
 0x1ac   :  { %256 = vpush %v182_v36 }
 0x1ad   :  { %v204_v41 = vrot.slane %v203_v37, 2  ;;  %258 = vpush %v192_v38 }
 0x1af   :  { %v205_v42 = vadd.f32 %v204_v41, %v203_v37 }
 0x1b1   :  { %v206_v45 = vrot.slane %v205_v42, 1 }
 0x1b3   :  { %v207_v46 = vadd.f32 %v206_v45, %v205_v42 }
 0x1b5   :  { %260 = vpush %v207_v46 }
 0x1b6   :  { %262 = vpush %v220_v47 }
 0x1b7   :  { %264 = vpush %v230_v48 }
 0x1d5   :  { %s255_s1 = spop %254 }
 0x1dd   :  { %s257_s5 = spop %256 }
 0x1de   :  { %s209_s7 = smul.f32 8.0, %s257_s5  ;;  %s259_s30 = spop %258 }
 0x1df   :  { %s212_s11 = smul.f32 4.0, %s259_s30 }
 0x1e6   :  { %s261_s9 = spop %260 }
 0x1e7   :  { %s210_s10 = sadd.f32 %s261_s9, %s209_s7  ;;  %s263_s13 = spop %262 }
 0x1e8   :  { %s265_s2 = spop %264 }
 0x1e9   :  { %s211_s12 = smul.f32 -0.5, %s210_s10 }
 0x1ea   :  { %s232_s19 = smul.f32 %s265_s2, %s255_s1 }
 0x1eb   :  { %s213_s14 = ssub.f32 %s211_s12, %s212_s11 }
 0x1ed   :  { %s222_s15 = smul.f32 %s263_s13, %s213_s14 }
 0x1ef   :  { %s223_s18 = sadd.f32 2.9445069e-10, %s222_s15 }
 0x1f1   :  { %s233_s20 = ssub.f32 %s232_s19, %s223_s18 }
 0x1f3   :  { %235 = sst [smem:[#allocation2]] %s233_s20 }
 0x1f4   :  { %244 = dma.smem_to_hbm %s296_s21, 16, %s242_s17, [#allocation3]  }
 0x1f5   :  { %292 = dma.done.wait [#allocation3], 16  }
 0x1f6   :  { %293 = vsyncadd [#allocation3], 4294967280 }
 0x1f7   :  { %249 = sfence }
 0x1f8   :  { %250 = vsyncpa [#allocation3], 1 }

</bundles_post_ra>
